<compile_context>
chip_gen: v5e
topology: v5e:2x2
jax: 0.10.0
libtpu: 0.0.40
codegen_flags: <defaults>
</compile_context>

<pallas_src>
import math

import jax
import jax.numpy as jnp
from jax.experimental import pallas as pl
from jax.experimental.pallas import tpu as pltpu


def _round_up(v, m):
    return ((v + m - 1) // m) * m


def _largest_divisor_tile(n_pad, candidates=(1024, 512, 256, 128)):
    """Largest candidate (multiple of 128) that evenly divides n_pad."""
    for c in candidates:
        if n_pad % c == 0:
            return c
    return 128  # n_pad is always a multiple of 128


# ----------------------------------------------------------------------------
# Kernels
# ----------------------------------------------------------------------------
def _fused_kernel(x_ref, w_ref, adj_ref, b_ref, out_ref):
    # Whole forward in one grid step (small graphs): support is computed once.
    s = jnp.dot(x_ref[...].astype(jnp.bfloat16), w_ref[...],
                preferred_element_type=jnp.float32)
    acc = jnp.dot(adj_ref[...].astype(jnp.bfloat16), s.astype(jnp.bfloat16),
                  preferred_element_type=jnp.float32)
    out_ref[...] = jnp.maximum(acc + b_ref[...], 0.0).astype(out_ref.dtype)


def _support_kernel(x_ref, w_ref, s_ref):
    # support tile = x_tile @ W   (bf16 operands, f32 accumulation on MXU)
    s = jnp.dot(x_ref[...].astype(jnp.bfloat16), w_ref[...],
                preferred_element_type=jnp.float32)
    s_ref[...] = s.astype(s_ref.dtype)


def _aggregate_kernel(adj_ref, s_ref, b_ref, out_ref, acc_ref):
    # out tile = relu(sum_k adj[i,k] @ support[k] + bias), K-tiled reduction.
    k = pl.program_id(1)

    @pl.when(k == 0)
    def _():
        acc_ref[...] = jnp.zeros_like(acc_ref)

    acc_ref[...] += jnp.dot(adj_ref[...].astype(jnp.bfloat16), s_ref[...],
                            preferred_element_type=jnp.float32)

    @pl.when(k == pl.num_programs(1) - 1)
    def _():
        acc = acc_ref[...] + b_ref[...]            # (tm, nhid_pad) + (1, nhid_pad)
        out_ref[...] = jnp.maximum(acc, 0.0).astype(out_ref.dtype)


# ----------------------------------------------------------------------------
# Wrapper
# ----------------------------------------------------------------------------
def gcn_forward(x, adj, weight, bias, *, fuse=None):
    """relu(adj @ (x @ weight) + bias); dropout is identity (eval mode)."""
    n, nfeat = x.shape
    nhid = weight.shape[1]

    nhid_pad = _round_up(nhid, 128)        # lane-dense output width (128)
    n_pad = _round_up(n, 128)              # rows/cols to next 128 only

    # Pad only when required and keep the ORIGINAL dtype (no bf16 repack).
    if n_pad != n:
        x_p = jnp.zeros((n_pad, nfeat), x.dtype).at[:n, :].set(x)
        adj_p = jnp.zeros((n_pad, n_pad), adj.dtype).at[:n, :n].set(adj)
    else:
        x_p, adj_p = x, adj

    # Weight / bias are tiny: one-time pad + bf16 cast of W is cheap.
    w_p = jnp.zeros((nfeat, nhid_pad), jnp.bfloat16).at[:, :nhid].set(
        weight.astype(jnp.bfloat16))
    b_p = jnp.zeros((1, nhid_pad), jnp.float32).at[0, :nhid].set(
        bias.astype(jnp.float32))

    vmem_limit = 48 << 20   # safe headroom under v7x's 64 MiB per-TC VMEM

    # ------------------------------------------------------------------ fused
    fused_bytes = (n_pad * n_pad * 4           # adj f32
                   + n_pad * nfeat * 4         # x f32
                   + nfeat * nhid_pad * 2      # W bf16
                   + 2 * n_pad * nhid_pad * 4  # support f32 + output f32
                   + nhid_pad * 4)             # bias
    if fuse is None:
        fuse = (n_pad <= 1024) and (fused_bytes <= (24 << 20))

    if fuse:
        out_p = pl.pallas_call(
            _fused_kernel,
            out_shape=jax.ShapeDtypeStruct((n_pad, nhid_pad), jnp.float32),
            grid_spec=pltpu.PrefetchScalarGridSpec(
                num_scalar_prefetch=0,
                grid=(1,),
                in_specs=[
                    pl.BlockSpec((n_pad, nfeat), lambda i: (0, 0)),      # x
                    pl.BlockSpec((nfeat, nhid_pad), lambda i: (0, 0)),   # W
                    pl.BlockSpec((n_pad, n_pad), lambda i: (0, 0)),      # adj
                    pl.BlockSpec((1, nhid_pad), lambda i: (0, 0)),       # bias
                ],
                out_specs=pl.BlockSpec((n_pad, nhid_pad), lambda i: (0, 0)),
            ),
            compiler_params=pltpu.CompilerParams(
                dimension_semantics=("arbitrary",),
                vmem_limit_bytes=vmem_limit,
            ),
            cost_estimate=pl.CostEstimate(
                flops=2 * n_pad * nfeat * nhid_pad
                      + 2 * n_pad * n_pad * nhid_pad,
                transcendentals=0,
                bytes_accessed=fused_bytes,
            ),
        )(x_p, w_p, adj_p, b_p)
        return out_p[:n, :nhid]

    # ------------------------------------------------------------------ split
    # kernel 1: support = x @ W  (computed ONCE, row-tiled, bf16 output)
    tm1 = _largest_divisor_tile(n_pad)
    # Guard the double-buffered f32 x tile against very wide nfeat (v7x VMEM).
    while tm1 > 128 and 2 * tm1 * nfeat * 4 > (16 << 20):
        tm1 //= 2

    support = pl.pallas_call(
        _support_kernel,
        out_shape=jax.ShapeDtypeStruct((n_pad, nhid_pad), jnp.bfloat16),
        grid_spec=pltpu.PrefetchScalarGridSpec(
            num_scalar_prefetch=0,
            grid=(n_pad // tm1,),
            in_specs=[
                pl.BlockSpec((tm1, nfeat), lambda i: (i, 0)),        # x rows
                pl.BlockSpec((nfeat, nhid_pad), lambda i: (0, 0)),   # W (full)
            ],
            out_specs=pl.BlockSpec((tm1, nhid_pad), lambda i: (i, 0)),
        ),
        compiler_params=pltpu.CompilerParams(
            dimension_semantics=("parallel",),
            vmem_limit_bytes=vmem_limit,
        ),
        cost_estimate=pl.CostEstimate(
            flops=2 * n_pad * nfeat * nhid_pad,
            transcendentals=0,
            bytes_accessed=(n_pad * nfeat * 4 + nfeat * nhid_pad * 2
                            + n_pad * nhid_pad * 2),
        ),
    )(x_p, w_p)

    # kernel 2: out = relu(adj @ support + bias), K-tiled with f32 accumulator
    tm = _largest_divisor_tile(n_pad)
    tk = _largest_divisor_tile(n_pad)

    out_p = pl.pallas_call(
        _aggregate_kernel,
        out_shape=jax.ShapeDtypeStruct((n_pad, nhid_pad), jnp.float32),
        grid_spec=pltpu.PrefetchScalarGridSpec(
            num_scalar_prefetch=0,
            grid=(n_pad // tm, n_pad // tk),
            in_specs=[
                pl.BlockSpec((tm, tk), lambda i, k: (i, k)),          # adj (f32)
                pl.BlockSpec((tk, nhid_pad), lambda i, k: (k, 0)),    # support
                pl.BlockSpec((1, nhid_pad), lambda i, k: (0, 0)),     # bias
            ],
            out_specs=pl.BlockSpec((tm, nhid_pad), lambda i, k: (i, 0)),
            scratch_shapes=[pltpu.VMEM((tm, nhid_pad), jnp.float32)],
        ),
        compiler_params=pltpu.CompilerParams(
            dimension_semantics=("parallel", "arbitrary"),
            vmem_limit_bytes=vmem_limit,
        ),
        cost_estimate=pl.CostEstimate(
            flops=2 * n_pad * n_pad * nhid_pad,
            transcendentals=0,
            bytes_accessed=(n_pad * n_pad * 4 + n_pad * nhid_pad * 2
                            + nhid_pad * 4 + n_pad * nhid_pad * 4),
        ),
    )(adj_p, support, b_p)

    return out_p[:n, :nhid]


def gcn_reference(x, adj, weight, bias):
    support = x @ weight
    out = adj @ support + bias
    return jnp.maximum(out, 0.0)


# ----------------------------------------------------------------------------
# Demo / self-test
# ----------------------------------------------------------------------------
if __name__ == "__main__":
    def make_inputs(key, n, nfeat, nhid):
        k_x, k_adj, k_w, k_b = jax.random.split(key, 4)
        x = jax.random.normal(k_x, (n, nfeat), dtype=jnp.float32)
        # Symmetric-normalized dense adjacency with self-loops (typical GCN).
        a = (jax.random.uniform(k_adj, (n, n)) < 0.05).astype(jnp.float32)
        a = jnp.maximum(a, a.T) + jnp.eye(n, dtype=jnp.float32)
        deg = jnp.sum(a, axis=1)
        d_inv_sqrt = 1.0 / jnp.sqrt(deg)
        adj = a * d_inv_sqrt[:, None] * d_inv_sqrt[None, :]
        # GraphConvolution.reset_parameters: uniform(-stdv, stdv), stdv=1/sqrt(nhid)
        stdv = 1.0 / math.sqrt(nhid)
        w = jax.random.uniform(k_w, (nfeat, nhid), minval=-stdv, maxval=stdv,
                               dtype=jnp.float32)
        b = jax.random.uniform(k_b, (nhid,), minval=-stdv, maxval=stdv,
                               dtype=jnp.float32)
        return x, adj, w, b

    key = jax.random.PRNGKey(0)
    k1, k2 = jax.random.split(key)

    # 1) Small graph -> fused single-kernel path.
    x, adj, w, b = make_inputs(k1, 128, 64, 32)
    out = jax.block_until_ready(gcn_forward(x, adj, w, b))
    ref = gcn_reference(x, adj, w, b)
    assert out.shape == (128, 32)
    # bf16 MXU operands with f32 accumulation -> slightly looser tolerance.
    assert jnp.allclose(out, ref, atol=2e-2, rtol=2e-2), "fused path mismatch"

    # 2) Ragged-size graph -> split, K-tiled accumulation path (multi K-step).
    x, adj, w, b = make_inputs(k2, 320, 96, 48)
    out = jax.block_until_ready(gcn_forward(x, adj, w, b, fuse=False))
    ref = gcn_reference(x, adj, w, b)
    assert out.shape == (320, 48)
    assert jnp.allclose(out, ref, atol=2e-2, rtol=2e-2), "split path mismatch"

    print("KERNEL_OK")
</pallas_src>

<mosaic_0001>
module attributes {stable_mosaic.version = 11 : i64} {
  func.func @_fused_kernel(%arg0: i32, %arg1: memref<128x64xf32, #tpu.memory_space<vmem>>, %arg2: memref<64x128xbf16, #tpu.memory_space<vmem>>, %arg3: memref<128x128xf32, #tpu.memory_space<vmem>>, %arg4: memref<1x128xf32, #tpu.memory_space<vmem>>, %arg5: memref<128x128xf32, #tpu.memory_space<vmem>>) attributes {dimension_semantics = [#tpu.dimension_semantics<arbitrary>], iteration_bounds = array<i64: 1>, scalar_prefetch = 0 : i64, scratch_operands = 0 : i64, tpu.core_type = #tpu.core_type<tc>, window_params = [{pipeline_mode = #tpu.pipeline_mode<synchronous>, transform_indices = @transform_0, window_bounds = array<i64: 128, 64>}, {pipeline_mode = #tpu.pipeline_mode<synchronous>, transform_indices = @transform_1, window_bounds = array<i64: 64, 128>}, {pipeline_mode = #tpu.pipeline_mode<synchronous>, transform_indices = @transform_2, window_bounds = array<i64: 128, 128>}, {pipeline_mode = #tpu.pipeline_mode<synchronous>, transform_indices = @transform_3, window_bounds = array<i64: 1, 128>}, {pipeline_mode = #tpu.pipeline_mode<synchronous>, transform_indices = @transform_4, window_bounds = array<i64: 128, 128>}]} {
    %c0 = arith.constant 0 : index
    %c0_0 = arith.constant 0 : index
    %0 = vector.load %arg1[%c0, %c0_0] : memref<128x64xf32, #tpu.memory_space<vmem>>, vector<128x64xf32>
    %1 = arith.truncf %0 : vector<128x64xf32> to vector<128x64xbf16>
    %c0_1 = arith.constant 0 : index
    %c0_2 = arith.constant 0 : index
    %2 = vector.load %arg2[%c0_1, %c0_2] : memref<64x128xbf16, #tpu.memory_space<vmem>>, vector<64x128xbf16>
    %cst = arith.constant dense<0.000000e+00> : vector<128x128xf32>
    %3 = tpu.matmul %1, %2, %cst {dimension_numbers = #tpu.dot_dimension_numbers<[1], [0], [0], [1], [0, 0, 1, 1], [], []>} : vector<128x64xbf16>, vector<64x128xbf16>, vector<128x128xf32> -> vector<128x128xf32>
    %c0_3 = arith.constant 0 : index
    %c0_4 = arith.constant 0 : index
    %4 = vector.load %arg3[%c0_3, %c0_4] : memref<128x128xf32, #tpu.memory_space<vmem>>, vector<128x128xf32>
    %5 = arith.truncf %4 : vector<128x128xf32> to vector<128x128xbf16>
    %6 = arith.truncf %3 : vector<128x128xf32> to vector<128x128xbf16>
    %cst_5 = arith.constant dense<0.000000e+00> : vector<128x128xf32>
    %7 = tpu.matmul %5, %6, %cst_5 {dimension_numbers = #tpu.dot_dimension_numbers<[1], [0], [0], [1], [0, 0, 1, 1], [], []>} : vector<128x128xbf16>, vector<128x128xbf16>, vector<128x128xf32> -> vector<128x128xf32>
    %c0_6 = arith.constant 0 : index
    %c0_7 = arith.constant 0 : index
    %8 = vector.load %arg4[%c0_6, %c0_7] : memref<1x128xf32, #tpu.memory_space<vmem>>, vector<1x128xf32>
    %9 = vector.broadcast %8 : vector<1x128xf32> to vector<128x128xf32>
    %10 = arith.addf %7, %9 : vector<128x128xf32>
    %cst_8 = arith.constant 0.000000e+00 : f32
    %11 = vector.broadcast %cst_8 : f32 to vector<128x128xf32>
    %12 = arith.maximumf %10, %11 : vector<128x128xf32>
    %c0_9 = arith.constant 0 : index
    %c0_10 = arith.constant 0 : index
    %13 = vector.load %arg5[%c0_9, %c0_10] : memref<128x128xf32, #tpu.memory_space<vmem>>, vector<128x128xf32>
    tpu.vector_store %arg5[%c0_9, %c0_10], %12 {strides = array<i32>} : memref<128x128xf32, #tpu.memory_space<vmem>>, vector<128x128xf32>,
    return
  }
  func.func @transform_0(%arg0: i32) -> (i32, i32) {
    %c0_i32 = arith.constant 0 : i32
    %c0_i32_0 = arith.constant 0 : i32
    %c0_i32_1 = arith.constant 0 : i32
    return %c0_i32, %c0_i32_0 : i32, i32
  }
  func.func @transform_1(%arg0: i32) -> (i32, i32) {
    %c0_i32 = arith.constant 0 : i32
    %c0_i32_0 = arith.constant 0 : i32
    %c0_i32_1 = arith.constant 0 : i32
    return %c0_i32, %c0_i32_0 : i32, i32
  }
  func.func @transform_2(%arg0: i32) -> (i32, i32) {
    %c0_i32 = arith.constant 0 : i32
    %c0_i32_0 = arith.constant 0 : i32
    %c0_i32_1 = arith.constant 0 : i32
    return %c0_i32, %c0_i32_0 : i32, i32
  }
  func.func @transform_3(%arg0: i32) -> (i32, i32) {
    %c0_i32 = arith.constant 0 : i32
    %c0_i32_0 = arith.constant 0 : i32
    %c0_i32_1 = arith.constant 0 : i32
    return %c0_i32, %c0_i32_0 : i32, i32
  }
  func.func @transform_4(%arg0: i32) -> (i32, i32) {
    %c0_i32 = arith.constant 0 : i32
    %c0_i32_0 = arith.constant 0 : i32
    %c0_i32_1 = arith.constant 0 : i32
    return %c0_i32, %c0_i32_0 : i32, i32
  }
}

</mosaic_0001>

<bundles_post_ra>
// kernel: tpu_custom_call.1
= control target key start
LH: loop header
LB: loop body
LE: loop exit
PB: predicated region body
PF: predicated region fallthrough
CT: control target
= control target key end

     0   :  { %s522_s0 = inlined_call_operand.vmem [shape: f32[128,64], index: 0, kind: input, shape index: {}]   ;;  %s523_s1 = inlined_call_operand.vmem [shape: bf16[64,128], index: 1, kind: input, shape index: {}]   ;;  %s524_s2 = inlined_call_operand.vmem [shape: f32[128,128], index: 2, kind: input, shape index: {}]   ;;  %s525_s3 = inlined_call_operand.vmem [shape: f32[1,128], index: 3, kind: input, shape index: {}]   ;;  %s526_s4 = inlined_call_operand.hbm [shape: f32[128,128], index: 4, kind: output, shape index: {}]  }
   0x1   :  { %v311_v0 = vld [vmem:[%s523_s1 + $0x18] sm:$0xff]  ;;  %v310_v1 = vld [vmem:[%s523_s1 + $0x10] sm:$0xff] }
   0x2   :  { %104 = vmatpush.bf16.msra.mxu0 %v311_v0  ;;  %312 = vmatpush.bf16.msra.mxu3 %v311_v0 }
   0x3   :  { %9 = vsyncpa [#allocation3], 0  ;;  %v309_v2 = vld [vmem:[%s523_s1 + $0x8] sm:$0xff]  ;;  %v308_v3 = vld [vmem:[%s523_s1] sm:$0xff]  ;;  %vm75_vm0 = vcmask 523264   ;;  %s272_s8 = sshll.u32 %s526_s4, 4  ;;  %s273_s8 = int_to_ptr.hbm [resolvable:$true] %s272_s8 }
   0x4   :  { %v19_v4 = vld [vmem:[%s522_s0] sm:$0xff]  ;;  %v20_v5 = vld [vmem:[%s522_s0 + $0x8] sm:$0xff]  ;;  %v29_v6 = vld [vmem:[%s522_s0 + $0x50] sm:$0xff]  ;;  %s355_s9 = smov 128   ;;  %s356_s10 = smov 8  }
   0x5   :  { %v30_v7 = vld [vmem:[%s522_s0 + $0x58] sm:$0xff]  ;;  %v35_v8 = vpack.c.bf16 %v20_v5, %v19_v4  ;;  %v21_v10 = vld [vmem:[%s522_s0 + $0x10] sm:$0xff]  ;;  %v31_v12 = vld [vmem:[%s522_s0 + $0x60] sm:$0xff] }
   0x6   :  { %105 = vmatpush.bf16.msra.mxu0 %v310_v1  ;;  %313 = vmatpush.bf16.msra.mxu3 %v310_v1  ;;  %v40_v9 = vpack.c.bf16 %v30_v7, %v29_v6  ;;  %v22_v11 = vld [vmem:[%s522_s0 + $0x18] sm:$0xff]  ;;  %v32_v13 = vld [vmem:[%s522_s0 + $0x68] sm:$0xff]  ;;  %v23_v16 = vld [vmem:[%s522_s0 + $0x20] sm:$0xff] }
   0x7   :  { %v36_v14 = vpack.c.bf16 %v22_v11, %v21_v10  ;;  %v41_v15 = vpack.c.bf16 %v32_v13, %v31_v12  ;;  %v24_v17 = vld [vmem:[%s522_s0 + $0x28] sm:$0xff]  ;;  %v33_v18 = vld [vmem:[%s522_s0 + $0x70] sm:$0xff]  ;;  %v34_v19 = vld [vmem:[%s522_s0 + $0x78] sm:$0xff] }
   0x8   :  { %v37_v20 = vpack.c.bf16 %v24_v17, %v23_v16  ;;  %v42_v21 = vpack.c.bf16 %v34_v19, %v33_v18  ;;  %v25_v22 = vld [vmem:[%s522_s0 + $0x30] sm:$0xff]  ;;  %v26_v23 = vld [vmem:[%s522_s0 + $0x38] sm:$0xff]  ;;  %v27_v25 = vld [vmem:[%s522_s0 + $0x40] sm:$0xff] }
   0x9   :  { %v38_v24 = vpack.c.bf16 %v26_v23, %v25_v22  ;;  %v28_v26 = vld [vmem:[%s522_s0 + $0x48] sm:$0xff]  ;;  %v149_v52 = vld [vmem:[%s524_s2] sm:$0xff]  ;;  %v151_v58 = vld [vmem:[%s524_s2 + $0x10] sm:$0xff] }
   0xa   :  { %106 = vmatpush.bf16.msra.mxu0 %v309_v2  ;;  %314 = vmatpush.bf16.msra.mxu3 %v309_v2  ;;  %v39_v27 = vpack.c.bf16 %v28_v26, %v27_v25  ;;  %v150_v53 = vld [vmem:[%s524_s2 + $0x8] sm:$0xff]  ;;  %v157_v54 = vld [vmem:[%s524_s2 + $0x40] sm:$0xff]  ;;  %v152_v59 = vld [vmem:[%s524_s2 + $0x18] sm:$0xff] }
   0xb   :  { %v158_v55 = vld [vmem:[%s524_s2 + $0x48] sm:$0xff]  ;;  %v165_v56 = vpack.c.bf16 %v150_v53, %v149_v52  ;;  %v159_v60 = vld [vmem:[%s524_s2 + $0x50] sm:$0xff]  ;;  %v160_v61 = vld [vmem:[%s524_s2 + $0x58] sm:$0xff]  ;;  %v166_v62 = vpack.c.bf16 %v152_v59, %v151_v58 }
   0xc   :  { %v169_v57 = vpack.c.bf16 %v158_v55, %v157_v54  ;;  %v170_v63 = vpack.c.bf16 %v160_v61, %v159_v60  ;;  %v153_v0 = vld [vmem:[%s524_s2 + $0x20] sm:$0xff]  ;;  %v154_v1 = vld [vmem:[%s524_s2 + $0x28] sm:$0xff]  ;;  %v155_v6 = vld [vmem:[%s524_s2 + $0x30] sm:$0xff] }
   0xd   :  { %v161_v2 = vld [vmem:[%s524_s2 + $0x60] sm:$0xff]  ;;  %v167_v4 = vpack.c.bf16 %v154_v1, %v153_v0  ;;  %v156_v7 = vld [vmem:[%s524_s2 + $0x38] sm:$0xff] }
   0xe   :  { %107 = vmatpush.bf16.msra.mxu0 %v308_v3  ;;  %315 = vmatpush.bf16.msra.mxu3 %v308_v3  ;;  %v162_v3 = vld [vmem:[%s524_s2 + $0x68] sm:$0xff]  ;;  %v168_v10 = vpack.c.bf16 %v156_v7, %v155_v6  ;;  %v501_v12 = vld [vmem:[%s525_s3] ss:$0 sm:$0xff] }
   0xf   :  { %v171_v5 = vpack.c.bf16 %v162_v3, %v161_v2 }
  0x11   :  { %300 = vmatmul.msk.bf16.vlgmr.msra.gmra.mxu0 %vm75_vm0, %v35_v8  ;;  %305 = vmatmul.msk.bf16.vlgmr.msra.gmra.mxu3 %vm75_vm0, %v40_v9  ;;  %v163_v8 = vld [vmem:[%s524_s2 + $0x70] sm:$0xff]  ;;  %v164_v9 = vld [vmem:[%s524_s2 + $0x78] sm:$0xff]  ;;  %s354_s2 = smov [#allocation2]  }
  0x12   :  { %v172_v11 = vpack.c.bf16 %v164_v9, %v163_v8  ;;  %s270_s3 = sshll.u32 %s354_s2, 4  ;;  %s271_s3 = int_to_ptr.vmem [resolvable:$true] %s270_s3 }
  0x21   :  { %301 = vmatmul.msk.bf16.gmra.mxu0 %vm75_vm0, %v36_v14  ;;  %306 = vmatmul.msk.bf16.gmra.mxu3 %vm75_vm0, %v41_v15 }
  0x31   :  { %302 = vmatmul.msk.bf16.gmra.mxu0 %vm75_vm0, %v37_v20  ;;  %307 = vmatmul.msk.bf16.gmra.mxu3 %vm75_vm0, %v42_v21 }
  0x41   :  { %303 = vmatmul.msk.bf16.gmra.mxu0 %vm75_vm0, %v38_v24 }
  0x51   :  { %304 = vmatmul.msk.bf16.gmra.mxu0 %vm75_vm0, %v39_v27 }
  0x8e   :  { %v109_v28 = vpop.f32.mrf.mxu0 }
  0x94   :  { %v134_v29 = vpop.f32.mrf.mxu3 }
  0x96   :  { %v111_v30 = vpop.f32.mrf.mxu0 }
  0x97   :  { %v173_v31 = vpack.c.bf16 %v111_v30, %v109_v28 }
  0x9c   :  { %v136_v32 = vpop.f32.mrf.mxu3 }
  0x9d   :  { %v178_v44 = vpack.c.bf16 %v136_v32, %v134_v29 }
  0x9e   :  { %v114_v33 = vpop.f32.mrf.mxu0 }
  0xa4   :  { %v139_v34 = vpop.f32.mrf.mxu3 }
  0xa6   :  { %v116_v35 = vpop.f32.mrf.mxu0 }
  0xa7   :  { %v174_v51 = vpack.c.bf16 %v116_v35, %v114_v33 }
  0xac   :  { %v141_v36 = vpop.f32.mrf.mxu3 }
  0xad   :  { %v179_v43 = vpack.c.bf16 %v141_v36, %v139_v34 }
  0xae   :  { %v119_v37 = vpop.f32.mrf.mxu0 }
  0xb4   :  { %v144_v38 = vpop.f32.mrf.mxu3 }
  0xb6   :  { %v121_v39 = vpop.f32.mrf.mxu0 }
  0xb7   :  { %v175_v50 = vpack.c.bf16 %v121_v39, %v119_v37 }
  0xbc   :  { %v146_v40 = vpop.f32.mrf.mxu3 }
  0xbd   :  { %v180_v41 = vpack.c.bf16 %v146_v40, %v144_v38 }
  0xbe   :  { %v124_v42 = vpop.f32.mrf.mxu0 }
  0xbf   :  { %185 = vmatpush.bf16.msra.mxu1 %v180_v41  ;;  %316 = vmatpush.bf16.msra.mxu2 %v180_v41 }
  0xc3   :  { %186 = vmatpush.bf16.msra.mxu1 %v179_v43  ;;  %317 = vmatpush.bf16.msra.mxu2 %v179_v43 }
  0xc6   :  { %v126_v45 = vpop.f32.mrf.mxu0 }
  0xc7   :  { %187 = vmatpush.bf16.msra.mxu1 %v178_v44  ;;  %318 = vmatpush.bf16.msra.mxu2 %v178_v44  ;;  %v176_v49 = vpack.c.bf16 %v126_v45, %v124_v42 }
  0xce   :  { %v129_v46 = vpop.f32.mrf.mxu0 }
  0xd6   :  { %v131_v47 = vpop.f32.mrf.mxu0 }
  0xd7   :  { %v177_v48 = vpack.c.bf16 %v131_v47, %v129_v46 }
  0xd9   :  { %188 = vmatpush.bf16.msra.mxu1 %v177_v48  ;;  %319 = vmatpush.bf16.msra.mxu2 %v177_v48 }
  0xdd   :  { %189 = vmatpush.bf16.msra.mxu1 %v176_v49  ;;  %320 = vmatpush.bf16.msra.mxu2 %v176_v49 }
  0xe1   :  { %190 = vmatpush.bf16.msra.mxu1 %v175_v50  ;;  %321 = vmatpush.bf16.msra.mxu2 %v175_v50 }
  0xe5   :  { %191 = vmatpush.bf16.msra.mxu1 %v174_v51  ;;  %322 = vmatpush.bf16.msra.mxu2 %v174_v51 }
  0xe9   :  { %192 = vmatpush.bf16.msra.mxu1 %v173_v31  ;;  %323 = vmatpush.bf16.msra.mxu2 %v173_v31 }
  0xec   :  { %193 = vmatmul.bf16.vlgmr.msra.gmra.mxu1 %v165_v56  ;;  %213 = vmatmul.bf16.vlgmr.msra.gmra.mxu2 %v169_v57 }
  0xfc   :  { %198 = vmatmul.bf16.gmra.mxu1 %v166_v62  ;;  %218 = vmatmul.bf16.gmra.mxu2 %v170_v63 }
 0x10c   :  { %203 = vmatmul.bf16.gmra.mxu1 %v167_v4  ;;  %223 = vmatmul.bf16.gmra.mxu2 %v171_v5 }
 0x11c   :  { %208 = vmatmul.bf16.gmra.mxu1 %v168_v10  ;;  %228 = vmatmul.bf16.gmra.mxu2 %v172_v11 }
 0x169   :  { %v194_v13 = vpop.f32.mrf.mxu1 }
 0x16a   :  { %v195_v14 = vadd.f32 %v501_v12, %v194_v13 }
 0x16c   :  { %v234_v15 = vmax.f32 %v195_v14, 0.0 }
 0x16e   :  { %250 = vst [vmem:[#allocation2] sm:$0xff] %v234_v15 }
 0x16f   :  { %v214_v16 = vpop.f32.mrf.mxu2 }
 0x170   :  { %v215_v17 = vadd.f32 %v501_v12, %v214_v16 }
 0x171   :  { %v196_v18 = vpop.f32.mrf.mxu1 }
 0x172   :  { %v242_v19 = vmax.f32 %v215_v17, 0.0  ;;  %v197_v20 = vadd.f32 %v501_v12, %v196_v18 }
 0x174   :  { %258 = vst [vmem:[#allocation2 + $0x40] sm:$0xff] %v242_v19  ;;  %v235_v21 = vmax.f32 %v197_v20, 0.0 }
 0x176   :  { %251 = vst [vmem:[#allocation2 + $0x8] sm:$0xff] %v235_v21 }
 0x177   :  { %v216_v22 = vpop.f32.mrf.mxu2 }
 0x178   :  { %v217_v23 = vadd.f32 %v501_v12, %v216_v22 }
 0x179   :  { %v199_v24 = vpop.f32.mrf.mxu1 }
 0x17a   :  { %v243_v25 = vmax.f32 %v217_v23, 0.0  ;;  %v200_v26 = vadd.f32 %v501_v12, %v199_v24 }
 0x17c   :  { %259 = vst [vmem:[#allocation2 + $0x48] sm:$0xff] %v243_v25  ;;  %v236_v27 = vmax.f32 %v200_v26, 0.0 }
 0x17e   :  { %252 = vst [vmem:[#allocation2 + $0x10] sm:$0xff] %v236_v27 }
 0x17f   :  { %v219_v28 = vpop.f32.mrf.mxu2 }
 0x180   :  { %v220_v29 = vadd.f32 %v501_v12, %v219_v28 }
 0x181   :  { %v201_v30 = vpop.f32.mrf.mxu1 }
 0x182   :  { %v244_v31 = vmax.f32 %v220_v29, 0.0  ;;  %v202_v32 = vadd.f32 %v501_v12, %v201_v30 }
 0x184   :  { %260 = vst [vmem:[#allocation2 + $0x50] sm:$0xff] %v244_v31  ;;  %v237_v33 = vmax.f32 %v202_v32, 0.0 }
 0x186   :  { %253 = vst [vmem:[#allocation2 + $0x18] sm:$0xff] %v237_v33 }
 0x187   :  { %v221_v34 = vpop.f32.mrf.mxu2 }
 0x188   :  { %v222_v35 = vadd.f32 %v501_v12, %v221_v34 }
 0x189   :  { %v204_v36 = vpop.f32.mrf.mxu1 }
 0x18a   :  { %v245_v37 = vmax.f32 %v222_v35, 0.0  ;;  %v205_v38 = vadd.f32 %v501_v12, %v204_v36 }
 0x18c   :  { %261 = vst [vmem:[#allocation2 + $0x58] sm:$0xff] %v245_v37  ;;  %v238_v39 = vmax.f32 %v205_v38, 0.0 }
 0x18e   :  { %254 = vst [vmem:[#allocation2 + $0x20] sm:$0xff] %v238_v39 }
 0x18f   :  { %v224_v40 = vpop.f32.mrf.mxu2 }
 0x190   :  { %v225_v41 = vadd.f32 %v501_v12, %v224_v40 }
 0x191   :  { %v206_v42 = vpop.f32.mrf.mxu1 }
 0x192   :  { %v246_v43 = vmax.f32 %v225_v41, 0.0  ;;  %v207_v44 = vadd.f32 %v501_v12, %v206_v42 }
 0x194   :  { %262 = vst [vmem:[#allocation2 + $0x60] sm:$0xff] %v246_v43  ;;  %v239_v45 = vmax.f32 %v207_v44, 0.0 }
 0x196   :  { %255 = vst [vmem:[#allocation2 + $0x28] sm:$0xff] %v239_v45 }
 0x197   :  { %v226_v46 = vpop.f32.mrf.mxu2 }
 0x198   :  { %v227_v47 = vadd.f32 %v501_v12, %v226_v46 }
 0x199   :  { %v209_v48 = vpop.f32.mrf.mxu1 }
 0x19a   :  { %v247_v49 = vmax.f32 %v227_v47, 0.0  ;;  %v210_v50 = vadd.f32 %v501_v12, %v209_v48 }
 0x19c   :  { %263 = vst [vmem:[#allocation2 + $0x68] sm:$0xff] %v247_v49  ;;  %v240_v51 = vmax.f32 %v210_v50, 0.0 }
 0x19e   :  { %256 = vst [vmem:[#allocation2 + $0x30] sm:$0xff] %v240_v51 }
 0x19f   :  { %v229_v52 = vpop.f32.mrf.mxu2 }
 0x1a0   :  { %v230_v53 = vadd.f32 %v501_v12, %v229_v52 }
 0x1a1   :  { %v211_v54 = vpop.f32.mrf.mxu1 }
 0x1a2   :  { %v248_v55 = vmax.f32 %v230_v53, 0.0  ;;  %v212_v56 = vadd.f32 %v501_v12, %v211_v54 }
 0x1a4   :  { %264 = vst [vmem:[#allocation2 + $0x70] sm:$0xff] %v248_v55  ;;  %v241_v57 = vmax.f32 %v212_v56, 0.0 }
 0x1a6   :  { %257 = vst [vmem:[#allocation2 + $0x38] sm:$0xff] %v241_v57 }
 0x1a7   :  { %v231_v58 = vpop.f32.mrf.mxu2 }
 0x1a8   :  { %v232_v59 = vadd.f32 %v501_v12, %v231_v58 }
 0x1aa   :  { %v249_v60 = vmax.f32 %v232_v59, 0.0 }
 0x1ac   :  { %265 = vst [vmem:[#allocation2 + $0x78] sm:$0xff] %v249_v60 }
 0x1ad   :  { %278 = dma.vmem_to_hbm [thread:$0]  %s271_s3, 2048, %s273_s8, [#allocation3], %s355_s9, %s355_s9, %s356_s10  }
 0x1ae   :  { %352 = dma.done.wait [#allocation3], 2048  }
 0x1af   :  { %353 = vsyncadd [#allocation3], 4294965248 }
 0x1b0   :  { %283 = vsyncpa [#allocation3], 1 }

</bundles_post_ra>
